<compile_context>
chip_gen: v7x
topology: tpu7x:2x2x1
jax: 0.10.0
libtpu: 0.0.40
codegen_flags: <defaults>
</compile_context>

<pallas_src>
import functools

import jax
import jax.numpy as jnp
from jax.experimental import pallas as pl
from jax.experimental.pallas import tpu as pltpu


def _round_up(x, m):
    return ((x + m - 1) // m) * m


def _device_kind():
    try:
        return jax.devices()[0].device_kind.lower()
    except Exception:
        return ""


def _mxu_cols():
    # v6e / v7x MXUs are 256 columns wide; v2-v5 generations are 128.
    kind = _device_kind()
    if any(tag in kind for tag in ("v2", "v3", "v4", "v5")):
        return 128
    return 256


def _is_dual_core():
    # v7x: two TensorCores per chip, 64 MiB VMEM.
    kind = _device_kind()
    return "v7" in kind or "7x" in kind


def _batch_tile(B):
    """Batch tile: multiple of 16 (bf16 sublane pairing), sized per generation."""
    B = max(int(B), 1)
    if B <= 16:
        return 16
    if _is_dual_core():
        cap = 256                                   # 64 MiB VMEM -> smaller tiles
        if B <= 2 * cap:
            return max(16, _round_up(pl.cdiv(B, 2), 16))   # >=2 tiles -> both TCs
        return cap
    return min(512, _round_up(B, 16))               # v5e/v6e: amortize per-step cost


# ----------------------------------------------------------------------------
# Parameter packing
# ----------------------------------------------------------------------------
def pack_params(w1, b1, wp, bp, wv, bv):
    """Pad / merge surrogate-model params into lane-dense bf16 weights."""
    D, H = w1.shape
    A = wp.shape[1]
    Hp = _round_up(H, _mxu_cols())       # fill the MXU columns on v6e/v7x
    HEADp = _round_up(A + 1, 128)        # policy lanes | value lane (lane-dense)
    Dp0 = _round_up(D, 128)
    if Dp0 * Hp * 2 <= (6 << 20):        # w1 comfortably fits VMEM untiled
        Dp = TK = Dp0
    else:                                # K-tile the first matmul (accumulator)
        TK = 512
        Dp = _round_up(D, TK)
    w1p = jnp.zeros((Dp, Hp), jnp.bfloat16).at[:D, :H].set(w1.astype(jnp.bfloat16))
    b1p = jnp.zeros((1, Hp), jnp.float32).at[:, :H].set(b1.reshape(1, H))
    whp = jnp.zeros((Hp, HEADp), jnp.bfloat16)
    whp = whp.at[:H, :A].set(wp.astype(jnp.bfloat16))
    whp = whp.at[:H, A:A + 1].set(wv.astype(jnp.bfloat16))
    bhp = jnp.zeros((1, HEADp), jnp.float32)
    bhp = bhp.at[:, :A].set(bp.reshape(1, A))
    bhp = bhp.at[:, A].set(bv.reshape(()))
    return dict(w1=w1p, b1=b1p, wh=whp, bh=bhp,
                D=D, H=H, A=A, Dp=Dp, Hp=Hp, HEADp=HEADp, TK=TK)


# ----------------------------------------------------------------------------
# Kernels
# ----------------------------------------------------------------------------
def _head_logits(acc_ref, b1_ref, wh_ref, bh_ref):
    h = jnp.maximum(acc_ref[...] + b1_ref[...], 0.0)                  # [BT,Hp] f32
    z = jnp.dot(h.astype(wh_ref.dtype), wh_ref[...],
                preferred_element_type=jnp.float32) + bh_ref[...]     # [BT,HEADp]
    return z


def alpha_forward_kernel(x_ref, w1_ref, b1_ref, wh_ref, bh_ref, out_ref, acc_ref,
                         *, num_actions):
    k = pl.program_id(1)

    @pl.when(k == 0)
    def _init():
        acc_ref[...] = jnp.zeros_like(acc_ref)

    acc_ref[...] += jnp.dot(x_ref[...], w1_ref[...],
                            preferred_element_type=jnp.float32)

    @pl.when(k == pl.num_programs(1) - 1)
    def _finalize():
        z = _head_logits(acc_ref, b1_ref, wh_ref, bh_ref)
        col = jax.lax.broadcasted_iota(jnp.int32, z.shape, 1)
        pol = col < num_actions
        vcol = col == num_actions
        masked = jnp.where(pol, z, -jnp.inf)
        m = jnp.max(masked, axis=-1, keepdims=True)
        e = jnp.exp(masked - m)                         # 0 on non-policy lanes
        s = jnp.sum(e, axis=-1, keepdims=True)
        pi = e * pl.reciprocal(s, approx=True)          # EUP vrcp
        # tanh only on the reduced value column (BTx1), not on all 128 lanes.
        v = jnp.tanh(jnp.sum(jnp.where(vcol, z, 0.0), axis=-1, keepdims=True))
        out = jnp.where(vcol, v, jnp.where(pol, pi, 0.0))
        out_ref[...] = out.astype(out_ref.dtype)        # lane-dense bf16 store


def alpha_loss_kernel(x_ref, w1_ref, b1_ref, wh_ref, bh_ref, tgt_ref, out_ref,
                      acc_ref, *, num_actions):
    k = pl.program_id(1)

    @pl.when(k == 0)
    def _init():
        acc_ref[...] = jnp.zeros_like(acc_ref)

    acc_ref[...] += jnp.dot(x_ref[...], w1_ref[...],
                            preferred_element_type=jnp.float32)

    @pl.when(k == pl.num_programs(1) - 1)
    def _finalize():
        z = _head_logits(acc_ref, b1_ref, wh_ref, bh_ref)
        col = jax.lax.broadcasted_iota(jnp.int32, z.shape, 1)
        pol = col < num_actions
        vcol = col == num_actions
        masked = jnp.where(pol, z, -jnp.inf)
        m = jnp.max(masked, axis=-1, keepdims=True)
        s = jnp.sum(jnp.exp(masked - m), axis=-1, keepdims=True)
        log_pi = z - m - jnp.log(s)                      # log-softmax (no log(0))
        tgt = tgt_ref[...].astype(jnp.float32)
        ce = jnp.sum(jnp.where(pol, tgt * log_pi, 0.0), axis=-1, keepdims=True)
        v_pred = jnp.tanh(jnp.sum(jnp.where(vcol, z, 0.0), axis=-1, keepdims=True))
        values = jnp.sum(jnp.where(vcol, tgt, 0.0), axis=-1, keepdims=True)
        loss = (values - v_pred) ** 2 - ce               # [BT, 1]
        # Only the loss is consumed downstream; no pi/v lane assembly, but keep
        # the store lane-dense (128 wide) so it stays an unmasked vst.
        out_ref[...] = jnp.broadcast_to(loss, out_ref.shape).astype(out_ref.dtype)


# ----------------------------------------------------------------------------
# Specs / call plumbing
# ----------------------------------------------------------------------------
def _specs(BT, TK, Hp, HEADp, out_width, nk, with_tgt, use_buffered):
    pm_const = pl.Buffered(1) if use_buffered else None   # constant blocks: 1 buffer
    pm_w1 = pm_const if nk == 1 else None                 # w1 varies with k if nk > 1

    def bs(shape, imap, pm=None):
        if pm is None:
            return pl.BlockSpec(shape, imap)
        return pl.BlockSpec(shape, imap, pipeline_mode=pm)

    in_specs = [
        bs((BT, TK), lambda i, k: (i, k)),                 # x (batch x K tiles)
        bs((TK, Hp), lambda i, k: (k, 0), pm_w1),          # w1
        bs((1, Hp), lambda i, k: (0, 0), pm_const),        # b1
        bs((Hp, HEADp), lambda i, k: (0, 0), pm_const),    # merged head weights
        bs((1, HEADp), lambda i, k: (0, 0), pm_const),     # merged head biases
    ]
    if with_tgt:
        in_specs.append(bs((BT, HEADp), lambda i, k: (i, 0)))
    out_specs = bs((BT, out_width), lambda i, k: (i, 0))
    return in_specs, out_specs


def _vmem_limit_kw(BT, TK, Hp, HEADp, out_width, out_bytes, nk, with_tgt,
                   use_buffered):
    wbuf = 1 if use_buffered else 2
    w1buf = wbuf if nk == 1 else 2
    b = 2 * BT * TK * 2                      # x, double-buffered, bf16
    b += w1buf * TK * Hp * 2                 # w1 bf16
    b += wbuf * 8 * Hp * 4                   # b1 (sublane-padded) f32
    b += wbuf * Hp * HEADp * 2               # wh bf16
    b += wbuf * 8 * HEADp * 4                # bh f32
    if with_tgt:
        b += 2 * BT * HEADp * 2              # tgt bf16
    b += 2 * BT * out_width * out_bytes      # out
    b += BT * Hp * 4                         # f32 accumulator scratch
    limit = int(1.5 * b) + (4 << 20)
    if limit <= (16 << 20):                  # fits the smallest default scoped VMEM
        return {}
    return {"vmem_limit_bytes": min(limit, 64 << 20)}


def _run(kernel_fn, arrays, *, BT, TK, Hp, HEADp, out_width, out_dtype,
         nb, nk, with_tgt):
    out_shape = jax.ShapeDtypeStruct((nb * BT, out_width), out_dtype)
    out_bytes = jnp.dtype(out_dtype).itemsize

    def build(use_buffered):
        in_specs, out_specs = _specs(BT, TK, Hp, HEADp, out_width, nk,
                                     with_tgt, use_buffered)
        cp = pltpu.CompilerParams(
            dimension_semantics=("parallel", "arbitrary"),
            **_vmem_limit_kw(BT, TK, Hp, HEADp, out_width, out_bytes, nk,
                             with_tgt, use_buffered))
        return pl.pallas_call(
            kernel_fn,
            out_shape=out_shape,
            grid=(nb, nk),
            in_specs=in_specs,
            out_specs=out_specs,
            scratch_shapes=[pltpu.VMEM((BT, Hp), jnp.float32)],
            compiler_params=cp)

    try:
        return build(True)(*arrays)
    except Exception:
        # Fallback if pipeline_mode=pl.Buffered(1) is rejected by this runtime.
        return build(False)(*arrays)


def _prep_x(processed_state, Dp):
    """Flatten + bf16-cast; pad only the feature axis.  The batch axis is left
    unpadded: the kernel grid uses cdiv(B, BT) with a partial edge tile and the
    wrapper slices off the padded rows (no extra [Bpad, Dp] HBM slab per call)."""
    B = processed_state.shape[0]
    x = processed_state.reshape(B, -1).astype(jnp.bfloat16)
    D = x.shape[1]
    if D < Dp:
        x = jnp.pad(x, ((0, 0), (0, Dp - D)))
    return x


# ----------------------------------------------------------------------------
# Public entry points (the module's forward() and AlphaModel.loss compute)
# ----------------------------------------------------------------------------
def alpha_evaluate(processed_state, packed):
    """forward(): processed_state [B,C,H,W] -> (pi [B,A], v [B,1]).

    TODO(synk): evaluation_queue/results_queue IPC and the pause_training
    spin-wait have no on-device equivalent; the wrapped model's evaluation is
    run directly here.  pi_clone/v_clone semantics hold for free (fresh pallas
    output buffers).  For MCTS-style tiny batches, batch more leaf states per
    call — the batch axis already tiles on a parallel grid axis.
    """
    B = processed_state.shape[0]
    A, Hp, HEADp = packed["A"], packed["Hp"], packed["HEADp"]
    Dp, TK = packed["Dp"], packed["TK"]
    BT = _batch_tile(B)
    nb = pl.cdiv(B, BT)
    nk = Dp // TK
    xp = _prep_x(processed_state, Dp)
    out = _run(functools.partial(alpha_forward_kernel, num_actions=A),
               (xp, packed["w1"], packed["b1"], packed["wh"], packed["bh"]),
               BT=BT, TK=TK, Hp=Hp, HEADp=HEADp, out_width=HEADp,
               out_dtype=jnp.bfloat16, nb=nb, nk=nk, with_tgt=False)
    pi = out[:B, :A].astype(jnp.float32)
    v = out[:B, A:A + 1].astype(jnp.float32)
    return pi, v


def alpha_loss(processed_state, packed, action_distns, values):
    """AlphaModel.loss fused with the forward pass.  Returns losses [B]."""
    B = processed_state.shape[0]
    A, Hp, HEADp = packed["A"], packed["Hp"], packed["HEADp"]
    Dp, TK = packed["Dp"], packed["TK"]
    BT = _batch_tile(B)
    nb = pl.cdiv(B, BT)
    nk = Dp // TK
    xp = _prep_x(processed_state, Dp)
    tgt = jnp.concatenate(
        [action_distns.astype(jnp.bfloat16),
         values.reshape(B, 1).astype(jnp.bfloat16)], axis=1)      # bf16 stream
    tgt = jnp.pad(tgt, ((0, 0), (0, HEADp - (A + 1))))
    out = _run(functools.partial(alpha_loss_kernel, num_actions=A),
               (xp, packed["w1"], packed["b1"], packed["wh"], packed["bh"], tgt),
               BT=BT, TK=TK, Hp=Hp, HEADp=HEADp, out_width=128,
               out_dtype=jnp.float32, nb=nb, nk=nk, with_tgt=True)
    return out[:B, 0]


# TODO(synk): train_queue / optimizer.step() / loss.backward() and the
# multiprocessing machinery itself have no Pallas equivalent and are not modeled.


if __name__ == "__main__":
    key = jax.random.PRNGKey(0)
    k_state, kw1, kwp, kwv, k_act, k_val = jax.random.split(key, 6)

    B, C, Hs, Ws = 2, 4, 8, 8          # processed_state: NCHW
    D = C * Hs * Ws                    # 256 flattened features
    H = 128                            # hidden width
    A = 16                             # number of actions

    processed_state = jax.random.normal(k_state, (B, C, Hs, Ws), jnp.float32)
    w1 = jax.random.normal(kw1, (D, H), jnp.float32) * 0.05
    b1 = jnp.zeros((H,), jnp.float32)
    wp = jax.random.normal(kwp, (H, A), jnp.float32) * 0.05
    bp = jnp.zeros((A,), jnp.float32)
    wv = jax.random.normal(kwv, (H, 1), jnp.float32) * 0.05
    bv = jnp.zeros((1,), jnp.float32)
    packed = pack_params(w1, b1, wp, bp, wv, bv)

    # forward (fused eval; clone semantics satisfied by fresh output buffers)
    pi, v = alpha_evaluate(processed_state, packed)

    # AlphaModel.loss (re-runs the forward, fused in one kernel)
    logits = jax.random.normal(k_act, (B, A), jnp.float32)
    action_distns = jax.nn.softmax(logits, axis=-1)
    values = jax.random.normal(k_val, (B, 1), jnp.float32)
    losses = alpha_loss(processed_state, packed, action_distns, values)

    jax.block_until_ready((pi, v, losses))

    # pure-JAX reference using the same bf16-rounded weights
    xr = processed_state.reshape(B, -1).astype(jnp.bfloat16).astype(jnp.float32)
    w1r = packed["w1"][:D, :H].astype(jnp.float32)
    whr = packed["wh"][:H, :A + 1].astype(jnp.float32)
    hr = jnp.maximum(xr @ w1r + b1[None, :], 0.0)
    zr = hr @ whr
    logits_r = zr[:, :A] + bp[None, :]
    pi_r = jax.nn.softmax(logits_r, axis=-1)
    v_r = jnp.tanh(zr[:, A:A + 1] + bv[None, :])
    loss_r = (values[:, 0] - v_r[:, 0]) ** 2 - jnp.sum(
        action_distns * jax.nn.log_softmax(logits_r, axis=-1), axis=-1)

    assert pi.shape == (B, A) and v.shape == (B, 1) and losses.shape == (B,)
    assert jnp.allclose(jnp.sum(pi, axis=-1), 1.0, atol=1e-2)
    assert jnp.allclose(pi, pi_r, atol=2e-2, rtol=2e-2)
    assert jnp.allclose(v, v_r, atol=2e-2, rtol=2e-2)
    assert jnp.allclose(losses, loss_r, atol=5e-2, rtol=5e-2)

    print("KERNEL_OK")
</pallas_src>

<mosaic_0001>
module attributes {stable_mosaic.version = 11 : i64} {
  func.func @alpha_forward_kernel(%arg0: i32, %arg1: i32, %arg2: memref<16x256xbf16, #tpu.memory_space<vmem>>, %arg3: memref<256x256xbf16, #tpu.memory_space<vmem>>, %arg4: memref<1x256xf32, #tpu.memory_space<vmem>>, %arg5: memref<256x128xbf16, #tpu.memory_space<vmem>>, %arg6: memref<1x128xf32, #tpu.memory_space<vmem>>, %arg7: memref<16x128xbf16, #tpu.memory_space<vmem>>, %arg8: memref<16x256xf32, #tpu.memory_space<vmem>>) attributes {dimension_semantics = [#tpu.dimension_semantics<parallel>, #tpu.dimension_semantics<arbitrary>], iteration_bounds = array<i64: 1, 1>, scalar_prefetch = 0 : i64, scratch_operands = 1 : i64, tpu.core_type = #tpu.core_type<tc>, window_params = [{transform_indices = @transform_0, window_bounds = array<i64: 16, 256>}, {pipeline_mode = #tpu.pipeline_mode<synchronous>, transform_indices = @transform_1, window_bounds = array<i64: 256, 256>}, {pipeline_mode = #tpu.pipeline_mode<synchronous>, transform_indices = @transform_2, window_bounds = array<i64: 1, 256>}, {pipeline_mode = #tpu.pipeline_mode<synchronous>, transform_indices = @transform_3, window_bounds = array<i64: 256, 128>}, {pipeline_mode = #tpu.pipeline_mode<synchronous>, transform_indices = @transform_4, window_bounds = array<i64: 1, 128>}, {transform_indices = @transform_5, window_bounds = array<i64: 16, 128>}]} {
    %c0_i32 = arith.constant 0 : i32
    %0 = arith.cmpi eq, %arg1, %c0_i32 : i32
    %1 = arith.extui %0 : i1 to i32
    %c0_i32_0 = arith.constant 0 : i32
    %2 = arith.cmpi ne, %1, %c0_i32_0 : i32
    scf.if %2 {
      %cst_10 = arith.constant 0.000000e+00 : f32
      %12 = vector.broadcast %cst_10 : f32 to vector<16x256xf32>
      %c0_11 = arith.constant 0 : index
      %c0_12 = arith.constant 0 : index
      %13 = vector.load %arg8[%c0_11, %c0_12] : memref<16x256xf32, #tpu.memory_space<vmem>>, vector<16x256xf32>
      tpu.vector_store %arg8[%c0_11, %c0_12], %12 {strides = array<i32>} : memref<16x256xf32, #tpu.memory_space<vmem>>, vector<16x256xf32>,
    } else {
    }
    %c0 = arith.constant 0 : index
    %c0_1 = arith.constant 0 : index
    %3 = vector.load %arg8[%c0, %c0_1] : memref<16x256xf32, #tpu.memory_space<vmem>>, vector<16x256xf32>
    %c0_2 = arith.constant 0 : index
    %c0_3 = arith.constant 0 : index
    %4 = vector.load %arg2[%c0_2, %c0_3] : memref<16x256xbf16, #tpu.memory_space<vmem>>, vector<16x256xbf16>
    %c0_4 = arith.constant 0 : index
    %c0_5 = arith.constant 0 : index
    %5 = vector.load %arg3[%c0_4, %c0_5] : memref<256x256xbf16, #tpu.memory_space<vmem>>, vector<256x256xbf16>
    %cst = arith.constant dense<0.000000e+00> : vector<16x256xf32>
    %6 = tpu.matmul %4, %5, %cst {dimension_numbers = #tpu.dot_dimension_numbers<[1], [0], [0], [1], [0, 0, 1, 1], [], []>} : vector<16x256xbf16>, vector<256x256xbf16>, vector<16x256xf32> -> vector<16x256xf32>
    %7 = arith.addf %3, %6 : vector<16x256xf32>
    %c0_6 = arith.constant 0 : index
    %c0_7 = arith.constant 0 : index
    %8 = vector.load %arg8[%c0_6, %c0_7] : memref<16x256xf32, #tpu.memory_space<vmem>>, vector<16x256xf32>
    tpu.vector_store %arg8[%c0_6, %c0_7], %7 {strides = array<i32>} : memref<16x256xf32, #tpu.memory_space<vmem>>, vector<16x256xf32>,
    %c0_i32_8 = arith.constant 0 : i32
    %9 = arith.cmpi eq, %arg1, %c0_i32_8 : i32
    %10 = arith.extui %9 : i1 to i32
    %c0_i32_9 = arith.constant 0 : i32
    %11 = arith.cmpi ne, %10, %c0_i32_9 : i32
    scf.if %11 {
      %c0_10 = arith.constant 0 : index
      %c0_11 = arith.constant 0 : index
      %12 = vector.load %arg8[%c0_10, %c0_11] : memref<16x256xf32, #tpu.memory_space<vmem>>, vector<16x256xf32>
      %c0_12 = arith.constant 0 : index
      %c0_13 = arith.constant 0 : index
      %13 = vector.load %arg4[%c0_12, %c0_13] : memref<1x256xf32, #tpu.memory_space<vmem>>, vector<1x256xf32>
      %14 = vector.broadcast %13 : vector<1x256xf32> to vector<16x256xf32>
      %15 = arith.addf %12, %14 : vector<16x256xf32>
      %cst_14 = arith.constant 0.000000e+00 : f32
      %16 = vector.broadcast %cst_14 : f32 to vector<16x256xf32>
      %17 = arith.maximumf %15, %16 : vector<16x256xf32>
      %18 = arith.truncf %17 : vector<16x256xf32> to vector<16x256xbf16>
      %c0_15 = arith.constant 0 : index
      %c0_16 = arith.constant 0 : index
      %19 = vector.load %arg5[%c0_15, %c0_16] : memref<256x128xbf16, #tpu.memory_space<vmem>>, vector<256x128xbf16>
      %cst_17 = arith.constant dense<0.000000e+00> : vector<16x128xf32>
      %20 = tpu.matmul %18, %19, %cst_17 {dimension_numbers = #tpu.dot_dimension_numbers<[1], [0], [0], [1], [0, 0, 1, 1], [], []>} : vector<16x256xbf16>, vector<256x128xbf16>, vector<16x128xf32> -> vector<16x128xf32>
      %c0_18 = arith.constant 0 : index
      %c0_19 = arith.constant 0 : index
      %21 = vector.load %arg6[%c0_18, %c0_19] : memref<1x128xf32, #tpu.memory_space<vmem>>, vector<1x128xf32>
      %22 = vector.broadcast %21 : vector<1x128xf32> to vector<16x128xf32>
      %23 = arith.addf %20, %22 : vector<16x128xf32>
      %24 = tpu.iota {dimensions = array<i32: 1>} : vector<16x128xi32>
      %c16_i32 = arith.constant 16 : i32
      %25 = vector.broadcast %c16_i32 : i32 to vector<16x128xi32>
      %26 = arith.cmpi slt, %24, %25 : vector<16x128xi32>
      %c16_i32_20 = arith.constant 16 : i32
      %27 = vector.broadcast %c16_i32_20 : i32 to vector<16x128xi32>
      %28 = arith.cmpi eq, %24, %27 : vector<16x128xi32>
      %cst_21 = arith.constant 0xFF800000 : f32
      %29 = vector.broadcast %cst_21 : f32 to vector<16x128xf32>
      %30 = arith.select %26, %23, %29 : vector<16x128xi1>, vector<16x128xf32>
      %cst_22 = arith.constant dense<0xFF800000> : vector<16xf32>
      %31 = vector.multi_reduction <maximumf>, %30, %cst_22 [1] : vector<16x128xf32> to vector<16xf32>
      %32 = vector.shape_cast %31 : vector<16xf32> to vector<16x1xf32>
      %33 = vector.broadcast %32 : vector<16x1xf32> to vector<16x128xf32>
      %34 = arith.subf %30, %33 : vector<16x128xf32>
      %35 = math.exp %34 : vector<16x128xf32>
      %cst_23 = arith.constant dense<0.000000e+00> : vector<16xf32>
      %36 = vector.multi_reduction <add>, %35, %cst_23 [1] : vector<16x128xf32> to vector<16xf32>
      %37 = vector.shape_cast %36 : vector<16xf32> to vector<16x1xf32>
      %38 = tpu.reciprocal %37 {approx = true} : vector<16x1xf32> -> vector<16x1xf32>
      %39 = vector.broadcast %38 : vector<16x1xf32> to vector<16x128xf32>
      %40 = arith.mulf %35, %39 : vector<16x128xf32>
      %cst_24 = arith.constant 0.000000e+00 : f32
      %41 = vector.broadcast %cst_24 : f32 to vector<16x128xf32>
      %42 = arith.select %28, %23, %41 : vector<16x128xi1>, vector<16x128xf32>
      %cst_25 = arith.constant dense<0.000000e+00> : vector<16xf32>
      %43 = vector.multi_reduction <add>, %42, %cst_25 [1] : vector<16x128xf32> to vector<16xf32>
      %44 = vector.shape_cast %43 : vector<16xf32> to vector<16x1xf32>
      %45 = math.tanh %44 : vector<16x1xf32>
      %cst_26 = arith.constant 0.000000e+00 : f32
      %46 = vector.broadcast %cst_26 : f32 to vector<16x128xf32>
      %47 = arith.select %26, %40, %46 : vector<16x128xi1>, vector<16x128xf32>
      %48 = vector.shape_cast %45 : vector<16x1xf32> to vector<16x1xf32>
      %49 = vector.broadcast %48 : vector<16x1xf32> to vector<16x128xf32>
      %50 = arith.select %28, %49, %47 : vector<16x128xi1>, vector<16x128xf32>
      %51 = arith.truncf %50 : vector<16x128xf32> to vector<16x128xbf16>
      %c0_27 = arith.constant 0 : index
      %c0_28 = arith.constant 0 : index
      %52 = vector.load %arg7[%c0_27, %c0_28] : memref<16x128xbf16, #tpu.memory_space<vmem>>, vector<16x128xbf16>
      tpu.vector_store %arg7[%c0_27, %c0_28], %51 {strides = array<i32>} : memref<16x128xbf16, #tpu.memory_space<vmem>>, vector<16x128xbf16>,
    } else {
    }
    return
  }
  func.func @transform_0(%arg0: i32, %arg1: i32) -> (i32, i32) {
    %c0_i32 = arith.constant 0 : i32
    return %arg0, %arg1 : i32, i32
  }
  func.func @transform_1(%arg0: i32, %arg1: i32) -> (i32, i32) {
    %c0_i32 = arith.constant 0 : i32
    %c0_i32_0 = arith.constant 0 : i32
    return %arg1, %c0_i32 : i32, i32
  }
  func.func @transform_2(%arg0: i32, %arg1: i32) -> (i32, i32) {
    %c0_i32 = arith.constant 0 : i32
    %c0_i32_0 = arith.constant 0 : i32
    %c0_i32_1 = arith.constant 0 : i32
    return %c0_i32, %c0_i32_0 : i32, i32
  }
  func.func @transform_3(%arg0: i32, %arg1: i32) -> (i32, i32) {
    %c0_i32 = arith.constant 0 : i32
    %c0_i32_0 = arith.constant 0 : i32
    %c0_i32_1 = arith.constant 0 : i32
    return %c0_i32, %c0_i32_0 : i32, i32
  }
  func.func @transform_4(%arg0: i32, %arg1: i32) -> (i32, i32) {
    %c0_i32 = arith.constant 0 : i32
    %c0_i32_0 = arith.constant 0 : i32
    %c0_i32_1 = arith.constant 0 : i32
    return %c0_i32, %c0_i32_0 : i32, i32
  }
  func.func @transform_5(%arg0: i32, %arg1: i32) -> (i32, i32) {
    %c0_i32 = arith.constant 0 : i32
    %c0_i32_0 = arith.constant 0 : i32
    return %arg0, %c0_i32 : i32, i32
  }
}

module attributes {stable_mosaic.version = 11 : i64} {
  func.func @alpha_forward_kernel(%arg0: i32, %arg1: i32, %arg2: memref<16x256xbf16, #tpu.memory_space<vmem>>, %arg3: memref<256x256xbf16, #tpu.memory_space<vmem>>, %arg4: memref<1x256xf32, #tpu.memory_space<vmem>>, %arg5: memref<256x128xbf16, #tpu.memory_space<vmem>>, %arg6: memref<1x128xf32, #tpu.memory_space<vmem>>, %arg7: memref<16x128xbf16, #tpu.memory_space<vmem>>, %arg8: memref<16x256xf32, #tpu.memory_space<vmem>>) attributes {dimension_semantics = [#tpu.dimension_semantics<parallel>, #tpu.dimension_semantics<arbitrary>], iteration_bounds = array<i64: 1, 1>, scalar_prefetch = 0 : i64, scratch_operands = 1 : i64, tpu.core_type = #tpu.core_type<tc>, window_params = [{transform_indices = @transform_0, window_bounds = array<i64: 16, 256>}, {transform_indices = @transform_1, window_bounds = array<i64: 256, 256>}, {pipeline_mode = #tpu.pipeline_mode<synchronous>, transform_indices = @transform_2, window_bounds = array<i64: 1, 256>}, {pipeline_mode = #tpu.pipeline_mode<synchronous>, transform_indices = @transform_3, window_bounds = array<i64: 256, 128>}, {pipeline_mode = #tpu.pipeline_mode<synchronous>, transform_indices = @transform_4, window_bounds = array<i64: 1, 128>}, {transform_indices = @transform_5, window_bounds = array<i64: 16, 128>}]} {
    %c0_i32 = arith.constant 0 : i32
    %0 = arith.cmpi eq, %arg1, %c0_i32 : i32
    %1 = arith.extui %0 : i1 to i32
    %c0_i32_0 = arith.constant 0 : i32
    %2 = arith.cmpi ne, %1, %c0_i32_0 : i32
    scf.if %2 {
      %cst_10 = arith.constant 0.000000e+00 : f32
      %12 = vector.broadcast %cst_10 : f32 to vector<16x256xf32>
      %c0_11 = arith.constant 0 : index
      %c0_12 = arith.constant 0 : index
      %13 = vector.load %arg8[%c0_11, %c0_12] : memref<16x256xf32, #tpu.memory_space<vmem>>, vector<16x256xf32>
      tpu.vector_store %arg8[%c0_11, %c0_12], %12 {strides = array<i32>} : memref<16x256xf32, #tpu.memory_space<vmem>>, vector<16x256xf32>,
    } else {
    }
    %c0 = arith.constant 0 : index
    %c0_1 = arith.constant 0 : index
    %3 = vector.load %arg8[%c0, %c0_1] : memref<16x256xf32, #tpu.memory_space<vmem>>, vector<16x256xf32>
    %c0_2 = arith.constant 0 : index
    %c0_3 = arith.constant 0 : index
    %4 = vector.load %arg2[%c0_2, %c0_3] : memref<16x256xbf16, #tpu.memory_space<vmem>>, vector<16x256xbf16>
    %c0_4 = arith.constant 0 : index
    %c0_5 = arith.constant 0 : index
    %5 = vector.load %arg3[%c0_4, %c0_5] : memref<256x256xbf16, #tpu.memory_space<vmem>>, vector<256x256xbf16>
    %cst = arith.constant dense<0.000000e+00> : vector<16x256xf32>
    %6 = tpu.matmul %4, %5, %cst {dimension_numbers = #tpu.dot_dimension_numbers<[1], [0], [0], [1], [0, 0, 1, 1], [], []>} : vector<16x256xbf16>, vector<256x256xbf16>, vector<16x256xf32> -> vector<16x256xf32>
    %7 = arith.addf %3, %6 : vector<16x256xf32>
    %c0_6 = arith.constant 0 : index
    %c0_7 = arith.constant 0 : index
    %8 = vector.load %arg8[%c0_6, %c0_7] : memref<16x256xf32, #tpu.memory_space<vmem>>, vector<16x256xf32>
    tpu.vector_store %arg8[%c0_6, %c0_7], %7 {strides = array<i32>} : memref<16x256xf32, #tpu.memory_space<vmem>>, vector<16x256xf32>,
    %c0_i32_8 = arith.constant 0 : i32
    %9 = arith.cmpi eq, %arg1, %c0_i32_8 : i32
    %10 = arith.extui %9 : i1 to i32
    %c0_i32_9 = arith.constant 0 : i32
    %11 = arith.cmpi ne, %10, %c0_i32_9 : i32
    scf.if %11 {
      %c0_10 = arith.constant 0 : index
      %c0_11 = arith.constant 0 : index
      %12 = vector.load %arg8[%c0_10, %c0_11] : memref<16x256xf32, #tpu.memory_space<vmem>>, vector<16x256xf32>
      %c0_12 = arith.constant 0 : index
      %c0_13 = arith.constant 0 : index
      %13 = vector.load %arg4[%c0_12, %c0_13] : memref<1x256xf32, #tpu.memory_space<vmem>>, vector<1x256xf32>
      %14 = vector.broadcast %13 : vector<1x256xf32> to vector<16x256xf32>
      %15 = arith.addf %12, %14 : vector<16x256xf32>
      %cst_14 = arith.constant 0.000000e+00 : f32
      %16 = vector.broadcast %cst_14 : f32 to vector<16x256xf32>
      %17 = arith.maximumf %15, %16 : vector<16x256xf32>
      %18 = arith.truncf %17 : vector<16x256xf32> to vector<16x256xbf16>
      %c0_15 = arith.constant 0 : index
      %c0_16 = arith.constant 0 : index
      %19 = vector.load %arg5[%c0_15, %c0_16] : memref<256x128xbf16, #tpu.memory_space<vmem>>, vector<256x128xbf16>
      %cst_17 = arith.constant dense<0.000000e+00> : vector<16x128xf32>
      %20 = tpu.matmul %18, %19, %cst_17 {dimension_numbers = #tpu.dot_dimension_numbers<[1], [0], [0], [1], [0, 0, 1, 1], [], []>} : vector<16x256xbf16>, vector<256x128xbf16>, vector<16x128xf32> -> vector<16x128xf32>
      %c0_18 = arith.constant 0 : index
      %c0_19 = arith.constant 0 : index
      %21 = vector.load %arg6[%c0_18, %c0_19] : memref<1x128xf32, #tpu.memory_space<vmem>>, vector<1x128xf32>
      %22 = vector.broadcast %21 : vector<1x128xf32> to vector<16x128xf32>
      %23 = arith.addf %20, %22 : vector<16x128xf32>
      %24 = tpu.iota {dimensions = array<i32: 1>} : vector<16x128xi32>
      %c16_i32 = arith.constant 16 : i32
      %25 = vector.broadcast %c16_i32 : i32 to vector<16x128xi32>
      %26 = arith.cmpi slt, %24, %25 : vector<16x128xi32>
      %c16_i32_20 = arith.constant 16 : i32
      %27 = vector.broadcast %c16_i32_20 : i32 to vector<16x128xi32>
      %28 = arith.cmpi eq, %24, %27 : vector<16x128xi32>
      %cst_21 = arith.constant 0xFF800000 : f32
      %29 = vector.broadcast %cst_21 : f32 to vector<16x128xf32>
      %30 = arith.select %26, %23, %29 : vector<16x128xi1>, vector<16x128xf32>
      %cst_22 = arith.constant dense<0xFF800000> : vector<16xf32>
      %31 = vector.multi_reduction <maximumf>, %30, %cst_22 [1] : vector<16x128xf32> to vector<16xf32>
      %32 = vector.shape_cast %31 : vector<16xf32> to vector<16x1xf32>
      %33 = vector.broadcast %32 : vector<16x1xf32> to vector<16x128xf32>
      %34 = arith.subf %30, %33 : vector<16x128xf32>
      %35 = math.exp %34 : vector<16x128xf32>
      %cst_23 = arith.constant dense<0.000000e+00> : vector<16xf32>
      %36 = vector.multi_reduction <add>, %35, %cst_23 [1] : vector<16x128xf32> to vector<16xf32>
      %37 = vector.shape_cast %36 : vector<16xf32> to vector<16x1xf32>
      %38 = tpu.reciprocal %37 {approx = true} : vector<16x1xf32> -> vector<16x1xf32>
      %39 = vector.broadcast %38 : vector<16x1xf32> to vector<16x128xf32>
      %40 = arith.mulf %35, %39 : vector<16x128xf32>
      %cst_24 = arith.constant 0.000000e+00 : f32
      %41 = vector.broadcast %cst_24 : f32 to vector<16x128xf32>
      %42 = arith.select %28, %23, %41 : vector<16x128xi1>, vector<16x128xf32>
      %cst_25 = arith.constant dense<0.000000e+00> : vector<16xf32>
      %43 = vector.multi_reduction <add>, %42, %cst_25 [1] : vector<16x128xf32> to vector<16xf32>
      %44 = vector.shape_cast %43 : vector<16xf32> to vector<16x1xf32>
      %45 = math.tanh %44 : vector<16x1xf32>
      %cst_26 = arith.constant 0.000000e+00 : f32
      %46 = vector.broadcast %cst_26 : f32 to vector<16x128xf32>
      %47 = arith.select %26, %40, %46 : vector<16x128xi1>, vector<16x128xf32>
      %48 = vector.shape_cast %45 : vector<16x1xf32> to vector<16x1xf32>
      %49 = vector.broadcast %48 : vector<16x1xf32> to vector<16x128xf32>
      %50 = arith.select %28, %49, %47 : vector<16x128xi1>, vector<16x128xf32>
      %51 = arith.truncf %50 : vector<16x128xf32> to vector<16x128xbf16>
      %c0_27 = arith.constant 0 : index
      %c0_28 = arith.constant 0 : index
      %52 = vector.load %arg7[%c0_27, %c0_28] : memref<16x128xbf16, #tpu.memory_space<vmem>>, vector<16x128xbf16>
      tpu.vector_store %arg7[%c0_27, %c0_28], %51 {strides = array<i32>} : memref<16x128xbf16, #tpu.memory_space<vmem>>, vector<16x128xbf16>,
    } else {
    }
    return
  }
  func.func @transform_0(%arg0: i32, %arg1: i32) -> (i32, i32) {
    %c0_i32 = arith.constant 0 : i32
    return %arg0, %arg1 : i32, i32
  }
  func.func @transform_1(%arg0: i32, %arg1: i32) -> (i32, i32) {
    %c0_i32 = arith.constant 0 : i32
    %c0_i32_0 = arith.constant 0 : i32
    return %arg1, %c0_i32 : i32, i32
  }
  func.func @transform_2(%arg0: i32, %arg1: i32) -> (i32, i32) {
    %c0_i32 = arith.constant 0 : i32
    %c0_i32_0 = arith.constant 0 : i32
    %c0_i32_1 = arith.constant 0 : i32
    return %c0_i32, %c0_i32_0 : i32, i32
  }
  func.func @transform_3(%arg0: i32, %arg1: i32) -> (i32, i32) {
    %c0_i32 = arith.constant 0 : i32
    %c0_i32_0 = arith.constant 0 : i32
    %c0_i32_1 = arith.constant 0 : i32
    return %c0_i32, %c0_i32_0 : i32, i32
  }
  func.func @transform_4(%arg0: i32, %arg1: i32) -> (i32, i32) {
    %c0_i32 = arith.constant 0 : i32
    %c0_i32_0 = arith.constant 0 : i32
    %c0_i32_1 = arith.constant 0 : i32
    return %c0_i32, %c0_i32_0 : i32, i32
  }
  func.func @transform_5(%arg0: i32, %arg1: i32) -> (i32, i32) {
    %c0_i32 = arith.constant 0 : i32
    %c0_i32_0 = arith.constant 0 : i32
    return %arg0, %c0_i32 : i32, i32
  }
}

</mosaic_0001>

<bundles_post_ra>
// kernel: tpu_custom_call.1
= control target key start
LH: loop header
LB: loop body
LE: loop exit
PB: predicated region body
PF: predicated region fallthrough
CT: control target
= control target key end

     0   :  { %10 = vsyncpa [#allocation4], 0  ;;  %s1066_s0 = inlined_call_operand.hbm [shape: bf16[2,256], index: 0, kind: input, shape index: {}]   ;;  %s1067_s1 = inlined_call_operand.hbm [shape: bf16[256,256], index: 1, kind: input, shape index: {}]   ;;  %s1068_s2 = inlined_call_operand.vmem [shape: f32[1,256], index: 2, kind: input, shape index: {}]   ;;  %s1069_s3 = inlined_call_operand.hbm [shape: bf16[256,128], index: 3, kind: input, shape index: {}]   ;;  %s1070_s4 = inlined_call_operand.vmem [shape: f32[1,128], index: 4, kind: input, shape index: {}]   ;;  %s1071_s5 = inlined_call_operand.hbm [shape: bf16[16,128], index: 5, kind: output, shape index: {}]  }
   0x1   :  { %11 = vsyncpa [#allocation7], 0 }
   0x2   :  { %12 = vsyncpa [#allocation5], 0 }
   0x3   :  { %17 = vsyncadd [#allocation4], 224  ;;  %s932_s18 = smov [#allocation6]   ;;  %s838_s22 = scalar_lea.hbm %s1067_s1, 4096 }
   0x4   :  { %s30_s19 = sshll.u32 %s932_s18, 4  ;;  %p839_p0 = scmp.ne.s32.totalorder %s1067_s1, %s838_s22  ;;  %s31_s19 = int_to_ptr.vmem [resolvable:$true] %s30_s19 }
   0x5   :  { %p842_p1 = scmp.lt.u32.totalorder %s838_s22, %s1067_s1 }
   0x7   :  { %p844_p2 = pnand %p842_p1, %p839_p0 }
   0x9   :  { %847 = shalt.err (!%p844_p2)
}
   0xa   :  { %s848_s27 = scalar_lea.vmem %s31_s19, 4096  ;;  %p853_p4 = scmp.lt.s32.totalorder %s31_s19, %s31_s19 }
   0xb   :  { %p849_p3 = scmp.ne.s32.totalorder %s31_s19, %s848_s27  ;;  %p854_p5 = scmp.lt.s32.totalorder %s848_s27, %s848_s27 }
   0xd   :  { %p855_p6 = por %p854_p5, %p853_p4 }
   0xf   :  { %p856_p7 = pnand %p855_p6, %p849_p3 }
  0x11   :  { %859 = shalt.err (!%p856_p7)
}
  0x12   :  { %s933_s28 = smov 128   ;;  %s934_s29 = smov 8  }
  0x13   :  { %36 = dma.hbm_to_vmem [thread:$0]  %s1067_s1, 4096, %s31_s19, [#allocation7], %s933_s28, %s933_s28, %s934_s29  }
  0x14   :  { %s935_s7 = smov [#allocation3]   ;;  %s860_s11 = scalar_lea.hbm %s1066_s0, 32 }
  0x15   :  { %s18_s8 = sshll.u32 %s935_s7, 4  ;;  %p861_p8 = scmp.ne.s32.totalorder %s1066_s0, %s860_s11  ;;  %s19_s8 = int_to_ptr.vmem [resolvable:$true] %s18_s8 }
  0x16   :  { %p864_p9 = scmp.lt.u32.totalorder %s860_s11, %s1066_s0 }
  0x18   :  { %p866_p10 = pnand %p864_p9, %p861_p8 }
  0x1a   :  { %869 = shalt.err (!%p866_p10)
}
  0x1b   :  { %s870_s16 = scalar_lea.vmem %s19_s8, 32  ;;  %s874_s1 = scalar_lea.vmem %s19_s8, 256 }
  0x1c   :  { %p871_p11 = scmp.ne.s32.totalorder %s19_s8, %s870_s16  ;;  %p875_p12 = scmp.lt.s32.totalorder %s19_s8, %s19_s8 }
  0x1d   :  { %p876_p13 = scmp.lt.s32.totalorder %s874_s1, %s870_s16 }
  0x1f   :  { %p877_p0 = por %p876_p13, %p875_p12 }
  0x21   :  { %p878_p1 = pnand %p877_p0, %p871_p11 }
  0x23   :  { %881 = shalt.err (!%p878_p1)
}
  0x24   :  { %s936_s17 = smov 32   ;;  %s937_s18 = smov 2  }
  0x25   :  { %24 = dma.hbm_to_vmem [thread:$0]  %s1066_s0, 32, %s19_s8, [#allocation4], %s936_s17, %s936_s17, %s937_s18  }
  0x26   :  { %s938_s21 = smov [#allocation8]   ;;  %s882_s25 = scalar_lea.hbm %s1069_s3, 2048 }
  0x27   :  { %s44_s22 = sshll.u32 %s938_s21, 4  ;;  %p883_p2 = scmp.ne.s32.totalorder %s1069_s3, %s882_s25  ;;  %s45_s22 = int_to_ptr.vmem [resolvable:$true] %s44_s22 }
  0x28   :  { %p886_p3 = scmp.lt.u32.totalorder %s882_s25, %s1069_s3 }
  0x2a   :  { %p888_p4 = pnand %p886_p3, %p883_p2 }
  0x2c   :  { %891 = shalt.err (!%p888_p4)
}
  0x2d   :  { %s892_s30 = scalar_lea.vmem %s45_s22, 2048  ;;  %p897_p6 = scmp.lt.s32.totalorder %s45_s22, %s45_s22 }
  0x2e   :  { %p893_p5 = scmp.ne.s32.totalorder %s45_s22, %s892_s30  ;;  %p898_p7 = scmp.lt.s32.totalorder %s892_s30, %s892_s30 }
  0x30   :  { %p899_p8 = por %p898_p7, %p897_p6 }
  0x32   :  { %p900_p9 = pnand %p899_p8, %p893_p5 }
  0x34   :  { %903 = shalt.err (!%p900_p9)
}
  0x35   :  { %s939_s0 = smov 64   ;;  %s940_s6 = smov 4  }
  0x36   :  { %50 = dma.hbm_to_vmem [thread:$0]  %s1069_s3, 2048, %s45_s22, [#allocation7], %s939_s0, %s939_s0, %s940_s6  }
  0x37   :  { %926 = dma.done.wait [#allocation4], 256  }
  0x38   :  { %927 = vsyncadd [#allocation4], 4294967040 }
  0x39   :  { %928 = dma.done.wait [#allocation7], 6144  }
  0x3a   :  { %929 = vsyncadd [#allocation7], 4294961152  ;;  %v762_v0 = vld [vmem:[#allocation6 + $0x4] ss:$8 sps:$4 sm:$0xff]   ;;  %v764_v1 = vld [vmem:[#allocation6] ss:$8 sps:$4 sm:$0xff]   ;;  %v130_v11 = vlaneseq }
  0x3b   :  { %351 = vmatprep.subr.bf16.mxu0 %v762_v0  ;;  %v765_v2 = vld [vmem:[#allocation6 + $0x14] ss:$8 sps:$4 sm:$0xff]   ;;  %v767_v3 = vld [vmem:[#allocation6 + $0x10] ss:$8 sps:$4 sm:$0xff]   ;;  %v768_v4 = vld [vmem:[#allocation6 + $0x24] ss:$8 sps:$4 sm:$0xff]  }
  0x3c   :  { %352 = vmatpush1.bf16.msra.mxu0 %v764_v1  ;;  %v770_v5 = vld [vmem:[#allocation6 + $0x20] ss:$8 sps:$4 sm:$0xff]   ;;  %v771_v6 = vld [vmem:[#allocation6 + $0x34] ss:$8 sps:$4 sm:$0xff]   ;;  %v773_v7 = vld [vmem:[#allocation6 + $0x30] ss:$8 sps:$4 sm:$0xff]  }
  0x3d   :  { %353 = vmatprep.subr.bf16.mxu0 %v765_v2  ;;  %v774_v8 = vld [vmem:[#allocation6 + $0x44] ss:$8 sps:$4 sm:$0xff]   ;;  %v941_v9 = vmov 1966171168   ;;  %v776_v12 = vld [vmem:[#allocation6 + $0x40] ss:$8 sps:$4 sm:$0xff]  }
  0x3e   :  { %v128_v10 = vunpack.c.l.s4 %v941_v9  ;;  %v777_v13 = vld [vmem:[#allocation6 + $0x54] ss:$8 sps:$4 sm:$0xff]   ;;  %v1013_v15 = vshrl.u32 %v130_v11, 7  ;;  %v779_v16 = vld [vmem:[#allocation6 + $0x50] ss:$8 sps:$4 sm:$0xff]   ;;  %v810_v34 = vld [vmem:[#allocation8 + $0x40] sm:$0xff]  }
  0x3f   :  { %v780_v17 = vld [vmem:[#allocation6 + $0x64] ss:$8 sps:$4 sm:$0xff]   ;;  %v782_v19 = vld [vmem:[#allocation6 + $0x60] ss:$8 sps:$4 sm:$0xff]   ;;  %v75_v20 = vld [vmem:[#allocation3] sm:$0x3]  ;;  %729 = vmatprep.subr.bf16.mxu1 %v810_v34 }
  0x40   :  { %354 = vmatpush1.bf16.msra.mxu0 %v767_v3  ;;  %v129_v14 = vunpack.c.0.s8 %v128_v10  ;;  %v76_v21 = vld [vmem:[#allocation3 + $0x2] sm:$0x3]  ;;  %v783_v22 = vld [vmem:[#allocation6 + $0x74] ss:$8 sps:$4 sm:$0xff]   ;;  %v79_v25 = vld [vmem:[#allocation3 + $0x8] sm:$0x3] }
  0x41   :  { %355 = vmatprep.subr.bf16.mxu0 %v768_v4  ;;  %v77_v23 = vld [vmem:[#allocation3 + $0x4] sm:$0x3]  ;;  %v78_v24 = vld [vmem:[#allocation3 + $0x6] sm:$0x3]  ;;  %v123_v26 = vcombine.low %v75_v20, %v76_v21  ;;  %v80_v27 = vld [vmem:[#allocation3 + $0xa] sm:$0x3] }
  0x42   :  { %v1016_v18 = vsub.s32 %v129_v14, %v1013_v15  ;;  %v81_v28 = vld [vmem:[#allocation3 + $0xc] sm:$0x3]  ;;  %v82_v29 = vld [vmem:[#allocation3 + $0xe] sm:$0x3]  ;;  %v124_v30 = vcombine.low %v77_v23, %v78_v24  ;;  %v125_v31 = vcombine.low %v79_v25, %v80_v27  ;;  %v785_v35 = vld [vmem:[#allocation6 + $0x70] ss:$8 sps:$4 sm:$0xff]  }
  0x43   :  { %v126_v32 = vcombine.low %v81_v28, %v82_v29  ;;  %v811_v37 = vld [vmem:[#allocation8] sm:$0xff]   ;;  %v812_v41 = vld [vmem:[#allocation8 + $0x48] sm:$0xff]   ;;  %v814_v45 = vld [vmem:[#allocation8 + $0x50] sm:$0xff]   ;;  %v417_v20 = vsub.s32 1, %v1013_v15 }
  0x44   :  { %356 = vmatpush1.bf16.msra.mxu0 %v770_v5  ;;  %v1019_v33 = vrot.slane %v123_v26, %v1016_v18  ;;  %v1022_v36 = vrot.slane %v124_v30, %v1016_v18  ;;  %v786_v38 = vld [vmem:[#allocation6 + $0x84] ss:$8 sps:$4 sm:$0xff]   ;;  %v147_v39 = vrot.slane %v125_v31, %v1016_v18  ;;  %730 = vmatpush3.bf16.msra.mxu1 %v811_v37  ;;  %v788_v46 = vld [vmem:[#allocation6 + $0x80] ss:$8 sps:$4 sm:$0xff]   ;;  %v789_v48 = vld [vmem:[#allocation6 + $0x94] ss:$8 sps:$4 sm:$0xff]  }
  0x45   :  { %357 = vmatprep.subr.bf16.mxu0 %v771_v6  ;;  %v154_v40 = vrot.slane %v126_v32, %v1016_v18  ;;  %v813_v43 = vld [vmem:[#allocation8 + $0x8] sm:$0xff]   ;;  %731 = vmatprep.subr.bf16.mxu1 %v812_v41  ;;  %v815_v50 = vld [vmem:[#allocation8 + $0x10] sm:$0xff]   ;;  %v816_v52 = vld [vmem:[#allocation8 + $0x58] sm:$0xff]  }
  0x46   :  { %v156_v42 = vcombine.high %v1019_v33, %v1022_v36  ;;  %v791_v53 = vld [vmem:[#allocation6 + $0x90] ss:$8 sps:$4 sm:$0xff]   ;;  %v792_v55 = vld [vmem:[#allocation6 + $0xa4] ss:$8 sps:$4 sm:$0xff]   ;;  %v794_v57 = vld [vmem:[#allocation6 + $0xa0] ss:$8 sps:$4 sm:$0xff]   ;;  %v155_v3 = vcombine.low %v1019_v33, %v1022_v36 }
  0x47   :  { %v158_v44 = vcombine.high %v147_v39, %v154_v40  ;;  %v817_v54 = vld [vmem:[#allocation8 + $0x18] sm:$0xff]   ;;  %v818_v56 = vld [vmem:[#allocation8 + $0x60] sm:$0xff]   ;;  %v820_v60 = vld [vmem:[#allocation8 + $0x68] sm:$0xff]   ;;  %v157_v4 = vcombine.low %v147_v39, %v154_v40 }
  0x48   :  { %358 = vmatpush1.bf16.msra.mxu0 %v773_v7  ;;  %v172_v47 = vrot.slane %v156_v42, %v1016_v18  ;;  %732 = vmatpush3.bf16.msra.mxu1 %v813_v43  ;;  %v819_v58 = vld [vmem:[#allocation8 + $0x20] sm:$0xff]   ;;  %v795_v59 = vld [vmem:[#allocation6 + $0xb4] ss:$8 sps:$4 sm:$0xff]   ;;  %v797_v61 = vld [vmem:[#allocation6 + $0xb0] ss:$8 sps:$4 sm:$0xff]   ;;  %v165_v7 = vrot.slane %v155_v3, %v1016_v18 }
  0x49   :  { %359 = vmatprep.subr.bf16.mxu0 %v774_v8  ;;  %v186_v49 = vrot.slane %v158_v44, %v1016_v18  ;;  %733 = vmatprep.subr.bf16.mxu1 %v814_v45  ;;  %v798_v62 = vld [vmem:[#allocation6 + $0xc4] ss:$8 sps:$4 sm:$0xff]   ;;  %v800_v63 = vld [vmem:[#allocation6 + $0xc0] ss:$8 sps:$4 sm:$0xff]   ;;  %v801_v0 = vld [vmem:[#allocation6 + $0xd4] ss:$8 sps:$4 sm:$0xff]   ;;  %v179_v8 = vrot.slane %v157_v4, %v1016_v18 }
  0x4a   :  { %v803_v1 = vld [vmem:[#allocation6 + $0xd0] ss:$8 sps:$4 sm:$0xff]   ;;  %v804_v2 = vld [vmem:[#allocation6 + $0xe4] ss:$8 sps:$4 sm:$0xff]   ;;  %v806_v5 = vld [vmem:[#allocation6 + $0xe0] ss:$8 sps:$4 sm:$0xff]  }
  0x4b   :  { %v188_v51 = vcombine.low %v172_v47, %v186_v49  ;;  %v807_v6 = vld [vmem:[#allocation6 + $0xf4] ss:$8 sps:$4 sm:$0xff]   ;;  %v809_v9 = vld [vmem:[#allocation6 + $0xf0] ss:$8 sps:$4 sm:$0xff]   ;;  %v187_v10 = vcombine.low %v165_v7, %v179_v8 }
  0x4c   :  { %360 = vmatpush1.bf16.msra.mxu0 %v776_v12  ;;  %734 = vmatpush3.bf16.msra.mxu1 %v815_v50  ;;  %v821_v12 = vld [vmem:[#allocation8 + $0x28] sm:$0xff]   ;;  %v823_v14 = vld [vmem:[#allocation8 + $0x30] sm:$0xff]  }
  0x4d   :  { %361 = vmatprep.subr.bf16.mxu0 %v777_v13  ;;  %383 = vmatprep.mubr.bf16.mxu0 %v188_v51  ;;  %v822_v13 = vld [vmem:[#allocation8 + $0x70] sm:$0xff]  }
  0x4e   :  { %735 = vmatprep.subr.bf16.mxu1 %v816_v52  ;;  %v409_v18 = vld [vmem:[%s1068_s2] sm:$0x3] }
  0x4f   :  { %v703_v39 = vld [vmem:[%s1070_s4] ss:$0 sm:$0xff]  ;;  %s942_s4 = smov [#allocation9]  }
  0x50   :  { %362 = vmatpush1.bf16.msra.mxu0 %v779_v16  ;;  %736 = vmatpush3.bf16.msra.mxu1 %v817_v54  ;;  %v824_v16 = vld [vmem:[#allocation8 + $0x78] sm:$0xff]   ;;  %s658_s11 = sshll.u32 %s942_s4, 4  ;;  %s659_s11 = int_to_ptr.vmem [resolvable:$true] %s658_s11 }
  0x51   :  { %363 = vmatprep.subr.bf16.mxu0 %v780_v17  ;;  %737 = vmatprep.subr.bf16.mxu1 %v818_v56  ;;  %v825_v17 = vld [vmem:[#allocation8 + $0x38] sm:$0xff]   ;;  %s904_s12 = scalar_lea.vmem %s659_s11, 128  ;;  %p909_p11 = scmp.lt.s32.totalorder %s659_s11, %s659_s11 }
  0x52   :  { %p905_p10 = scmp.ne.s32.totalorder %s659_s11, %s904_s12  ;;  %p910_p12 = scmp.lt.s32.totalorder %s904_s12, %s904_s12 }
  0x54   :  { %364 = vmatpush1.bf16.msra.mxu0 %v782_v19  ;;  %738 = vmatpush3.bf16.msra.mxu1 %v819_v58  ;;  %v413_v19 = vsub.s32 0, %v1013_v15  ;;  %v608_v15 = vand.u32 127, %v130_v11  ;;  %p911_p13 = por %p910_p12, %p909_p11 }
  0x55   :  { %365 = vmatprep.subr.bf16.mxu0 %v783_v22  ;;  %739 = vmatprep.subr.bf16.mxu1 %v820_v60  ;;  %v418_v22 = vrot.slane %v409_v18, %v417_v20 }
  0x56   :  { %v414_v21 = vrot.slane %v409_v18, %v413_v19  ;;  %vm609_vm0 = vcmp.lt.s32.totalorder %v608_v15, 16  ;;  %vm610_vm1 = vcmp.eq.s32.totalorder %v608_v15, 16  ;;  %p912_p0 = pnand %p911_p13, %p905_p10 }
  0x58   :  { %366 = vmatpush1.bf16.msra.mxu0 %v785_v35  ;;  %740 = vmatpush3.bf16.msra.mxu1 %v821_v12 }
  0x59   :  { %367 = vmatprep.subr.bf16.mxu0 %v786_v38  ;;  %741 = vmatprep.subr.bf16.mxu1 %v822_v13 }
  0x5c   :  { %368 = vmatpush1.bf16.msra.mxu0 %v788_v46  ;;  %742 = vmatpush3.bf16.msra.mxu1 %v823_v14 }
  0x5d   :  { %369 = vmatprep.subr.bf16.mxu0 %v789_v48  ;;  %743 = vmatprep.subr.bf16.mxu1 %v824_v16 }
  0x60   :  { %370 = vmatpush1.bf16.msra.mxu0 %v791_v53  ;;  %744 = vmatpush3.bf16.msra.mxu1 %v825_v17 }
  0x61   :  { %371 = vmatprep.subr.bf16.mxu0 %v792_v55 }
  0x64   :  { %372 = vmatpush1.bf16.msra.mxu0 %v794_v57 }
  0x65   :  { %373 = vmatprep.subr.bf16.mxu0 %v795_v59 }
  0x68   :  { %374 = vmatpush1.bf16.msra.mxu0 %v797_v61 }
  0x69   :  { %375 = vmatprep.subr.bf16.mxu0 %v798_v62 }
  0x6c   :  { %376 = vmatpush1.bf16.msra.mxu0 %v800_v63 }
  0x6d   :  { %377 = vmatprep.subr.bf16.mxu0 %v801_v0 }
  0x70   :  { %378 = vmatpush1.bf16.msra.mxu0 %v803_v1 }
  0x71   :  { %379 = vmatprep.subr.bf16.mxu0 %v804_v2 }
  0x74   :  { %380 = vmatpush1.bf16.msra.mxu0 %v806_v5 }
  0x75   :  { %381 = vmatprep.subr.bf16.mxu0 %v807_v6 }
  0x78   :  { %382 = vmatpush1.bf16.msra.mxu0 %v809_v9 }
  0x7b   :  { %384 = vmatmul.mubr.bf16.vlgmr.msra.gmra.mrb[0].mxu0 %v187_v10 }
 0x14e   :  { %v385_v23 = vpop.f32.mrb[0].mxu0 }
 0x14f   :  { %v421_v24 = vadd.f32 %v414_v21, %v385_v23  ;;  %v387_v25 = vpop.f32.mrb[1].mxu0 }
 0x150   :  { %v422_v26 = vadd.f32 %v418_v22, %v387_v25  ;;  %v389_v27 = vpop.f32.mrb[2].mxu0 }
 0x151   :  { %v423_v28 = vadd.f32 %v414_v21, %v389_v27  ;;  %v391_v29 = vpop.f32.mrb[3].mxu0  ;;  %v425_v31 = vmax.f32 %v421_v24, 0.0 }
 0x152   :  { %v424_v30 = vadd.f32 %v418_v22, %v391_v29  ;;  %v426_v33 = vmax.f32 %v422_v26, 0.0 }
 0x153   :  { %v427_v32 = vmax.f32 %v423_v28, 0.0 }
 0x154   :  { %v428_v34 = vmax.f32 %v424_v30, 0.0 }
 0x155   :  { %v429_v35 = vpack.c.bf16 %v427_v32, %v425_v31 }
 0x156   :  { %v430_v36 = vpack.c.bf16 %v428_v34, %v426_v33 }
 0x158   :  { %598 = vmatprep.mubr.bf16.mxu1 %v430_v36 }
 0x159   :  { %599 = vmatmul.mubr.bf16.vlgmr.msra.gmra.mrb[0].mxu1 %v429_v35 }
 0x22c   :  { %v745_v37 = vpop.f32.mrb[0].mxu1 }
 0x22d   :  { %v746_v38 = vpop.f32.mrb[1].mxu1 }
 0x22e   :  { %v747_v40 = vadd.f32 %v746_v38, %v745_v37  ;;  %v748_v41 = vpop.f32.mrb[2].mxu1 }
 0x22f   :  { %v749_v42 = vpop.f32.mrb[3].mxu1 }
 0x230   :  { %v750_v43 = vadd.f32 %v749_v42, %v748_v41  ;;  %v601_v44 = vadd.f32 %v747_v40, %v703_v39 }
 0x232   :  { %v611_v45 = vsel %vm609_vm0, %v601_v44, -inf  ;;  %v604_v46 = vadd.f32 %v750_v43, %v703_v39  ;;  %v631_v11 = vsel %vm610_vm1, %v601_v44, 0.0 }
 0x233   :  { %613 = vmax.xlane.f32.xlu0 %v611_v45 }
 0x234   :  { %v612_v47 = vsel %vm609_vm0, %v604_v46, -inf  ;;  %v632_v56 = vsel %vm610_vm1, %v604_v46, 0.0 }
 0x237   :  { %615 = vmax.xlane.f32.xlu0 %v612_v47 }
 0x23b   :  { %633 = vadd.xlane.f32.xlu0 %v631_v11 }
 0x2c0   :  { %v614_v48 = vpop.xlane.xlu0 %613 }
 0x2c1   :  { %v617_v49 = vsub.f32 %v611_v45, %v614_v48 }
 0x2c3   :  { %v619_v50 = vmul.f32 1.442695, %v617_v49 }
 0x2c4   :  { %v616_v51 = vpop.xlane.xlu0 %615 }
 0x2c5   :  { %826 = vpow2.f32 %v619_v50  ;;  %v618_v52 = vsub.f32 %v612_v47, %v616_v51 }
 0x2c7   :  { %v621_v53 = vmul.f32 1.442695, %v618_v52 }
 0x2c8   :  { %v634_v59 = vpop.xlane.xlu0 %633 }
 0x2c9   :  { %828 = vpow2.f32 %v621_v53 }
 0x2cf   :  { %v827_v54 = vpop.eup %826 }
 0x2d0   :  { %623 = vadd.xlane.f32.xlu1 %v827_v54 }
 0x2d3   :  { %v829_v55 = vpop.eup %828 }
 0x2d4   :  { %625 = vadd.xlane.f32.xlu1 %v829_v55 }
 0x2d8   :  { %635 = vadd.xlane.f32.xlu1 %v632_v56 }
 0x35d   :  { %v624_v57 = vpop.xlane.xlu1 %623 }
 0x35e   :  { %830 = vrcp.f32 %v624_v57 }
 0x361   :  { %v626_v58 = vpop.xlane.xlu1 %625 }
 0x362   :  { %832 = vrcp.f32 %v626_v58 }
 0x363   :  { %834 = vtanh.f32 %v634_v59 }
 0x365   :  { %v636_v60 = vpop.xlane.xlu1 %635 }
 0x366   :  { %836 = vtanh.f32 %v636_v60 }
 0x368   :  { %v831_v61 = vpop.eup %830 }
 0x369   :  { %v629_v62 = vmul.f32 %v831_v61, %v827_v54 }
 0x36b   :  { %v639_v1 = vsel %vm609_vm0, %v629_v62, 0.0 }
 0x36c   :  { %v833_v63 = vpop.eup %832 }
 0x36d   :  { %v630_v0 = vmul.f32 %v833_v63, %v829_v55  ;;  %v835_v2 = vpop.eup %834 }
 0x36e   :  { %v641_v5 = vsel %vm610_vm1, %v835_v2, %v639_v1 }
 0x36f   :  { %v640_v3 = vsel %vm609_vm0, %v630_v0, 0.0 }
 0x370   :  { %v837_v4 = vpop.eup %836 }
 0x371   :  { %v642_v6 = vsel %vm610_vm1, %v837_v4, %v640_v3 }
 0x372   :  { %v727_v7 = vpack.c.bf16 %v642_v6, %v641_v5 }
 0x374   :  { %728 = vst [vmem:[#allocation9] sm:$0xff] %v727_v7  }
 0x375   :  { %915 = shalt.err (!%p912_p0)
}
 0x376   :  { %s916_s15 = scalar_lea.hbm %s1071_s5, 128 }
 0x377   :  { %p917_p1 = scmp.ne.s32.totalorder %s1071_s5, %s916_s15  ;;  %p920_p2 = scmp.lt.u32.totalorder %s916_s15, %s1071_s5 }
 0x379   :  { %p922_p3 = pnand %p920_p2, %p917_p1 }
 0x37b   :  { %925 = shalt.err (!%p922_p3)
}
 0x37c   :  { %664 = dma.vmem_to_hbm [thread:$0]  %s659_s11, 128, %s1071_s5, [#allocation5], %s939_s0, %s939_s0, %s940_s6  }
 0x37d   :  { %930 = dma.done.wait [#allocation5], 128  }
 0x37e   :  { %931 = vsyncadd [#allocation5], 4294967168 }
 0x37f   :  { %668 = vsyncpa [#allocation4], 1 }
 0x380   :  { %669 = vsyncpa [#allocation7], 1 }
 0x381   :  { %670 = vsyncpa [#allocation5], 1 }

// kernel: tpu_custom_call.1
= control target key start
LH: loop header
LB: loop body
LE: loop exit
PB: predicated region body
PF: predicated region fallthrough
CT: control target
= control target key end

     0   :  { %10 = vsyncpa [#allocation4], 0  ;;  %s1066_s0 = inlined_call_operand.hbm [shape: bf16[2,256], index: 0, kind: input, shape index: {}]   ;;  %s1067_s1 = inlined_call_operand.hbm [shape: bf16[256,256], index: 1, kind: input, shape index: {}]   ;;  %s1068_s2 = inlined_call_operand.vmem [shape: f32[1,256], index: 2, kind: input, shape index: {}]   ;;  %s1069_s3 = inlined_call_operand.hbm [shape: bf16[256,128], index: 3, kind: input, shape index: {}]   ;;  %s1070_s4 = inlined_call_operand.vmem [shape: f32[1,128], index: 4, kind: input, shape index: {}]   ;;  %s1071_s5 = inlined_call_operand.hbm [shape: bf16[16,128], index: 5, kind: output, shape index: {}]  }
   0x1   :  { %11 = vsyncpa [#allocation7], 0 }
   0x2   :  { %12 = vsyncpa [#allocation5], 0 }
   0x3   :  { %17 = vsyncadd [#allocation4], 224  ;;  %s932_s18 = smov [#allocation6]   ;;  %s838_s22 = scalar_lea.hbm %s1067_s1, 4096 }
   0x4   :  { %s30_s19 = sshll.u32 %s932_s18, 4  ;;  %p839_p0 = scmp.ne.s32.totalorder %s1067_s1, %s838_s22  ;;  %s31_s19 = int_to_ptr.vmem [resolvable:$true] %s30_s19 }
   0x5   :  { %p842_p1 = scmp.lt.u32.totalorder %s838_s22, %s1067_s1 }
   0x7   :  { %p844_p2 = pnand %p842_p1, %p839_p0 }
   0x9   :  { %847 = shalt.err (!%p844_p2)
}
   0xa   :  { %s848_s27 = scalar_lea.vmem %s31_s19, 4096  ;;  %p853_p4 = scmp.lt.s32.totalorder %s31_s19, %s31_s19 }
   0xb   :  { %p849_p3 = scmp.ne.s32.totalorder %s31_s19, %s848_s27  ;;  %p854_p5 = scmp.lt.s32.totalorder %s848_s27, %s848_s27 }
   0xd   :  { %p855_p6 = por %p854_p5, %p853_p4 }
   0xf   :  { %p856_p7 = pnand %p855_p6, %p849_p3 }
  0x11   :  { %859 = shalt.err (!%p856_p7)
}
  0x12   :  { %s933_s28 = smov 128   ;;  %s934_s29 = smov 8  }
  0x13   :  { %36 = dma.hbm_to_vmem [thread:$0]  %s1067_s1, 4096, %s31_s19, [#allocation7], %s933_s28, %s933_s28, %s934_s29  }
  0x14   :  { %s935_s7 = smov [#allocation3]   ;;  %s860_s11 = scalar_lea.hbm %s1066_s0, 32 }
  0x15   :  { %s18_s8 = sshll.u32 %s935_s7, 4  ;;  %p861_p8 = scmp.ne.s32.totalorder %s1066_s0, %s860_s11  ;;  %s19_s8 = int_to_ptr.vmem [resolvable:$true] %s18_s8 }
  0x16   :  { %p864_p9 = scmp.lt.u32.totalorder %s860_s11, %s1066_s0 }
  0x18   :  { %p866_p10 = pnand %p864_p9, %p861_p8 }
  0x1a   :  { %869 = shalt.err (!%p866_p10)
}
  0x1b   :  { %s870_s16 = scalar_lea.vmem %s19_s8, 32  ;;  %s874_s1 = scalar_lea.vmem %s19_s8, 256 }
  0x1c   :  { %p871_p11 = scmp.ne.s32.totalorder %s19_s8, %s870_s16  ;;  %p875_p12 = scmp.lt.s32.totalorder %s19_s8, %s19_s8 }
  0x1d   :  { %p876_p13 = scmp.lt.s32.totalorder %s874_s1, %s870_s16 }
  0x1f   :  { %p877_p0 = por %p876_p13, %p875_p12 }
  0x21   :  { %p878_p1 = pnand %p877_p0, %p871_p11 }
  0x23   :  { %881 = shalt.err (!%p878_p1)
}
  0x24   :  { %s936_s17 = smov 32   ;;  %s937_s18 = smov 2  }
  0x25   :  { %24 = dma.hbm_to_vmem [thread:$0]  %s1066_s0, 32, %s19_s8, [#allocation4], %s936_s17, %s936_s17, %s937_s18  }
  0x26   :  { %s938_s21 = smov [#allocation8]   ;;  %s882_s25 = scalar_lea.hbm %s1069_s3, 2048 }
  0x27   :  { %s44_s22 = sshll.u32 %s938_s21, 4  ;;  %p883_p2 = scmp.ne.s32.totalorder %s1069_s3, %s882_s25  ;;  %s45_s22 = int_to_ptr.vmem [resolvable:$true] %s44_s22 }
  0x28   :  { %p886_p3 = scmp.lt.u32.totalorder %s882_s25, %s1069_s3 }
  0x2a   :  { %p888_p4 = pnand %p886_p3, %p883_p2 }
  0x2c   :  { %891 = shalt.err (!%p888_p4)
}
  0x2d   :  { %s892_s30 = scalar_lea.vmem %s45_s22, 2048  ;;  %p897_p6 = scmp.lt.s32.totalorder %s45_s22, %s45_s22 }
  0x2e   :  { %p893_p5 = scmp.ne.s32.totalorder %s45_s22, %s892_s30  ;;  %p898_p7 = scmp.lt.s32.totalorder %s892_s30, %s892_s30 }
  0x30   :  { %p899_p8 = por %p898_p7, %p897_p6 }
  0x32   :  { %p900_p9 = pnand %p899_p8, %p893_p5 }
  0x34   :  { %903 = shalt.err (!%p900_p9)
}
  0x35   :  { %s939_s0 = smov 64   ;;  %s940_s6 = smov 4  }
  0x36   :  { %50 = dma.hbm_to_vmem [thread:$0]  %s1069_s3, 2048, %s45_s22, [#allocation7], %s939_s0, %s939_s0, %s940_s6  }
  0x37   :  { %926 = dma.done.wait [#allocation4], 256  }
  0x38   :  { %927 = vsyncadd [#allocation4], 4294967040 }
  0x39   :  { %928 = dma.done.wait [#allocation7], 6144  }
  0x3a   :  { %929 = vsyncadd [#allocation7], 4294961152  ;;  %v762_v0 = vld [vmem:[#allocation6 + $0x4] ss:$8 sps:$4 sm:$0xff]   ;;  %v764_v1 = vld [vmem:[#allocation6] ss:$8 sps:$4 sm:$0xff]   ;;  %v130_v11 = vlaneseq }
  0x3b   :  { %351 = vmatprep.subr.bf16.mxu0 %v762_v0  ;;  %v765_v2 = vld [vmem:[#allocation6 + $0x14] ss:$8 sps:$4 sm:$0xff]   ;;  %v767_v3 = vld [vmem:[#allocation6 + $0x10] ss:$8 sps:$4 sm:$0xff]   ;;  %v768_v4 = vld [vmem:[#allocation6 + $0x24] ss:$8 sps:$4 sm:$0xff]  }
  0x3c   :  { %352 = vmatpush1.bf16.msra.mxu0 %v764_v1  ;;  %v770_v5 = vld [vmem:[#allocation6 + $0x20] ss:$8 sps:$4 sm:$0xff]   ;;  %v771_v6 = vld [vmem:[#allocation6 + $0x34] ss:$8 sps:$4 sm:$0xff]   ;;  %v773_v7 = vld [vmem:[#allocation6 + $0x30] ss:$8 sps:$4 sm:$0xff]  }
  0x3d   :  { %353 = vmatprep.subr.bf16.mxu0 %v765_v2  ;;  %v774_v8 = vld [vmem:[#allocation6 + $0x44] ss:$8 sps:$4 sm:$0xff]   ;;  %v941_v9 = vmov 1966171168   ;;  %v776_v12 = vld [vmem:[#allocation6 + $0x40] ss:$8 sps:$4 sm:$0xff]  }
  0x3e   :  { %v128_v10 = vunpack.c.l.s4 %v941_v9  ;;  %v777_v13 = vld [vmem:[#allocation6 + $0x54] ss:$8 sps:$4 sm:$0xff]   ;;  %v1013_v15 = vshrl.u32 %v130_v11, 7  ;;  %v779_v16 = vld [vmem:[#allocation6 + $0x50] ss:$8 sps:$4 sm:$0xff]   ;;  %v810_v34 = vld [vmem:[#allocation8 + $0x40] sm:$0xff]  }
  0x3f   :  { %v780_v17 = vld [vmem:[#allocation6 + $0x64] ss:$8 sps:$4 sm:$0xff]   ;;  %v782_v19 = vld [vmem:[#allocation6 + $0x60] ss:$8 sps:$4 sm:$0xff]   ;;  %v75_v20 = vld [vmem:[#allocation3] sm:$0x3]  ;;  %729 = vmatprep.subr.bf16.mxu1 %v810_v34 }
  0x40   :  { %354 = vmatpush1.bf16.msra.mxu0 %v767_v3  ;;  %v129_v14 = vunpack.c.0.s8 %v128_v10  ;;  %v76_v21 = vld [vmem:[#allocation3 + $0x2] sm:$0x3]  ;;  %v783_v22 = vld [vmem:[#allocation6 + $0x74] ss:$8 sps:$4 sm:$0xff]   ;;  %v79_v25 = vld [vmem:[#allocation3 + $0x8] sm:$0x3] }
  0x41   :  { %355 = vmatprep.subr.bf16.mxu0 %v768_v4  ;;  %v77_v23 = vld [vmem:[#allocation3 + $0x4] sm:$0x3]  ;;  %v78_v24 = vld [vmem:[#allocation3 + $0x6] sm:$0x3]  ;;  %v123_v26 = vcombine.low %v75_v20, %v76_v21  ;;  %v80_v27 = vld [vmem:[#allocation3 + $0xa] sm:$0x3] }
  0x42   :  { %v1016_v18 = vsub.s32 %v129_v14, %v1013_v15  ;;  %v81_v28 = vld [vmem:[#allocation3 + $0xc] sm:$0x3]  ;;  %v82_v29 = vld [vmem:[#allocation3 + $0xe] sm:$0x3]  ;;  %v124_v30 = vcombine.low %v77_v23, %v78_v24  ;;  %v125_v31 = vcombine.low %v79_v25, %v80_v27  ;;  %v785_v35 = vld [vmem:[#allocation6 + $0x70] ss:$8 sps:$4 sm:$0xff]  }
  0x43   :  { %v126_v32 = vcombine.low %v81_v28, %v82_v29  ;;  %v811_v37 = vld [vmem:[#allocation8] sm:$0xff]   ;;  %v812_v41 = vld [vmem:[#allocation8 + $0x48] sm:$0xff]   ;;  %v814_v45 = vld [vmem:[#allocation8 + $0x50] sm:$0xff]   ;;  %v417_v20 = vsub.s32 1, %v1013_v15 }
  0x44   :  { %356 = vmatpush1.bf16.msra.mxu0 %v770_v5  ;;  %v1019_v33 = vrot.slane %v123_v26, %v1016_v18  ;;  %v1022_v36 = vrot.slane %v124_v30, %v1016_v18  ;;  %v786_v38 = vld [vmem:[#allocation6 + $0x84] ss:$8 sps:$4 sm:$0xff]   ;;  %v147_v39 = vrot.slane %v125_v31, %v1016_v18  ;;  %730 = vmatpush3.bf16.msra.mxu1 %v811_v37  ;;  %v788_v46 = vld [vmem:[#allocation6 + $0x80] ss:$8 sps:$4 sm:$0xff]   ;;  %v789_v48 = vld [vmem:[#allocation6 + $0x94] ss:$8 sps:$4 sm:$0xff]  }
  0x45   :  { %357 = vmatprep.subr.bf16.mxu0 %v771_v6  ;;  %v154_v40 = vrot.slane %v126_v32, %v1016_v18  ;;  %v813_v43 = vld [vmem:[#allocation8 + $0x8] sm:$0xff]   ;;  %731 = vmatprep.subr.bf16.mxu1 %v812_v41  ;;  %v815_v50 = vld [vmem:[#allocation8 + $0x10] sm:$0xff]   ;;  %v816_v52 = vld [vmem:[#allocation8 + $0x58] sm:$0xff]  }
  0x46   :  { %v156_v42 = vcombine.high %v1019_v33, %v1022_v36  ;;  %v791_v53 = vld [vmem:[#allocation6 + $0x90] ss:$8 sps:$4 sm:$0xff]   ;;  %v792_v55 = vld [vmem:[#allocation6 + $0xa4] ss:$8 sps:$4 sm:$0xff]   ;;  %v794_v57 = vld [vmem:[#allocation6 + $0xa0] ss:$8 sps:$4 sm:$0xff]   ;;  %v155_v3 = vcombine.low %v1019_v33, %v1022_v36 }
  0x47   :  { %v158_v44 = vcombine.high %v147_v39, %v154_v40  ;;  %v817_v54 = vld [vmem:[#allocation8 + $0x18] sm:$0xff]   ;;  %v818_v56 = vld [vmem:[#allocation8 + $0x60] sm:$0xff]   ;;  %v820_v60 = vld [vmem:[#allocation8 + $0x68] sm:$0xff]   ;;  %v157_v4 = vcombine.low %v147_v39, %v154_v40 }
  0x48   :  { %358 = vmatpush1.bf16.msra.mxu0 %v773_v7  ;;  %v172_v47 = vrot.slane %v156_v42, %v1016_v18  ;;  %732 = vmatpush3.bf16.msra.mxu1 %v813_v43  ;;  %v819_v58 = vld [vmem:[#allocation8 + $0x20] sm:$0xff]   ;;  %v795_v59 = vld [vmem:[#allocation6 + $0xb4] ss:$8 sps:$4 sm:$0xff]   ;;  %v797_v61 = vld [vmem:[#allocation6 + $0xb0] ss:$8 sps:$4 sm:$0xff]   ;;  %v165_v7 = vrot.slane %v155_v3, %v1016_v18 }
  0x49   :  { %359 = vmatprep.subr.bf16.mxu0 %v774_v8  ;;  %v186_v49 = vrot.slane %v158_v44, %v1016_v18  ;;  %733 = vmatprep.subr.bf16.mxu1 %v814_v45  ;;  %v798_v62 = vld [vmem:[#allocation6 + $0xc4] ss:$8 sps:$4 sm:$0xff]   ;;  %v800_v63 = vld [vmem:[#allocation6 + $0xc0] ss:$8 sps:$4 sm:$0xff]   ;;  %v801_v0 = vld [vmem:[#allocation6 + $0xd4] ss:$8 sps:$4 sm:$0xff]   ;;  %v179_v8 = vrot.slane %v157_v4, %v1016_v18 }
  0x4a   :  { %v803_v1 = vld [vmem:[#allocation6 + $0xd0] ss:$8 sps:$4 sm:$0xff]   ;;  %v804_v2 = vld [vmem:[#allocation6 + $0xe4] ss:$8 sps:$4 sm:$0xff]   ;;  %v806_v5 = vld [vmem:[#allocation6 + $0xe0] ss:$8 sps:$4 sm:$0xff]  }
  0x4b   :  { %v188_v51 = vcombine.low %v172_v47, %v186_v49  ;;  %v807_v6 = vld [vmem:[#allocation6 + $0xf4] ss:$8 sps:$4 sm:$0xff]   ;;  %v809_v9 = vld [vmem:[#allocation6 + $0xf0] ss:$8 sps:$4 sm:$0xff]   ;;  %v187_v10 = vcombine.low %v165_v7, %v179_v8 }
  0x4c   :  { %360 = vmatpush1.bf16.msra.mxu0 %v776_v12  ;;  %734 = vmatpush3.bf16.msra.mxu1 %v815_v50  ;;  %v821_v12 = vld [vmem:[#allocation8 + $0x28] sm:$0xff]   ;;  %v823_v14 = vld [vmem:[#allocation8 + $0x30] sm:$0xff]  }
  0x4d   :  { %361 = vmatprep.subr.bf16.mxu0 %v777_v13  ;;  %383 = vmatprep.mubr.bf16.mxu0 %v188_v51  ;;  %v822_v13 = vld [vmem:[#allocation8 + $0x70] sm:$0xff]  }
  0x4e   :  { %735 = vmatprep.subr.bf16.mxu1 %v816_v52  ;;  %v409_v18 = vld [vmem:[%s1068_s2] sm:$0x3] }
  0x4f   :  { %v703_v39 = vld [vmem:[%s1070_s4] ss:$0 sm:$0xff]  ;;  %s942_s4 = smov [#allocation9]  }
  0x50   :  { %362 = vmatpush1.bf16.msra.mxu0 %v779_v16  ;;  %736 = vmatpush3.bf16.msra.mxu1 %v817_v54  ;;  %v824_v16 = vld [vmem:[#allocation8 + $0x78] sm:$0xff]   ;;  %s658_s11 = sshll.u32 %s942_s4, 4  ;;  %s659_s11 = int_to_ptr.vmem [resolvable:$true] %s658_s11 }
  0x51   :  { %363 = vmatprep.subr.bf16.mxu0 %v780_v17  ;;  %737 = vmatprep.subr.bf16.mxu1 %v818_v56  ;;  %v825_v17 = vld [vmem:[#allocation8 + $0x38] sm:$0xff]   ;;  %s904_s12 = scalar_lea.vmem %s659_s11, 128  ;;  %p909_p11 = scmp.lt.s32.totalorder %s659_s11, %s659_s11 }
  0x52   :  { %p905_p10 = scmp.ne.s32.totalorder %s659_s11, %s904_s12  ;;  %p910_p12 = scmp.lt.s32.totalorder %s904_s12, %s904_s12 }
  0x54   :  { %364 = vmatpush1.bf16.msra.mxu0 %v782_v19  ;;  %738 = vmatpush3.bf16.msra.mxu1 %v819_v58  ;;  %v413_v19 = vsub.s32 0, %v1013_v15  ;;  %v608_v15 = vand.u32 127, %v130_v11  ;;  %p911_p13 = por %p910_p12, %p909_p11 }
  0x55   :  { %365 = vmatprep.subr.bf16.mxu0 %v783_v22  ;;  %739 = vmatprep.subr.bf16.mxu1 %v820_v60  ;;  %v418_v22 = vrot.slane %v409_v18, %v417_v20 }
  0x56   :  { %v414_v21 = vrot.slane %v409_v18, %v413_v19  ;;  %vm609_vm0 = vcmp.lt.s32.totalorder %v608_v15, 16  ;;  %vm610_vm1 = vcmp.eq.s32.totalorder %v608_v15, 16  ;;  %p912_p0 = pnand %p911_p13, %p905_p10 }
  0x58   :  { %366 = vmatpush1.bf16.msra.mxu0 %v785_v35  ;;  %740 = vmatpush3.bf16.msra.mxu1 %v821_v12 }
  0x59   :  { %367 = vmatprep.subr.bf16.mxu0 %v786_v38  ;;  %741 = vmatprep.subr.bf16.mxu1 %v822_v13 }
  0x5c   :  { %368 = vmatpush1.bf16.msra.mxu0 %v788_v46  ;;  %742 = vmatpush3.bf16.msra.mxu1 %v823_v14 }
  0x5d   :  { %369 = vmatprep.subr.bf16.mxu0 %v789_v48  ;;  %743 = vmatprep.subr.bf16.mxu1 %v824_v16 }
  0x60   :  { %370 = vmatpush1.bf16.msra.mxu0 %v791_v53  ;;  %744 = vmatpush3.bf16.msra.mxu1 %v825_v17 }
  0x61   :  { %371 = vmatprep.subr.bf16.mxu0 %v792_v55 }
  0x64   :  { %372 = vmatpush1.bf16.msra.mxu0 %v794_v57 }
  0x65   :  { %373 = vmatprep.subr.bf16.mxu0 %v795_v59 }
  0x68   :  { %374 = vmatpush1.bf16.msra.mxu0 %v797_v61 }
  0x69   :  { %375 = vmatprep.subr.bf16.mxu0 %v798_v62 }
  0x6c   :  { %376 = vmatpush1.bf16.msra.mxu0 %v800_v63 }
  0x6d   :  { %377 = vmatprep.subr.bf16.mxu0 %v801_v0 }
  0x70   :  { %378 = vmatpush1.bf16.msra.mxu0 %v803_v1 }
  0x71   :  { %379 = vmatprep.subr.bf16.mxu0 %v804_v2 }
  0x74   :  { %380 = vmatpush1.bf16.msra.mxu0 %v806_v5 }
  0x75   :  { %381 = vmatprep.subr.bf16.mxu0 %v807_v6 }
  0x78   :  { %382 = vmatpush1.bf16.msra.mxu0 %v809_v9 }
  0x7b   :  { %384 = vmatmul.mubr.bf16.vlgmr.msra.gmra.mrb[0].mxu0 %v187_v10 }
 0x14e   :  { %v385_v23 = vpop.f32.mrb[0].mxu0 }
 0x14f   :  { %v421_v24 = vadd.f32 %v414_v21, %v385_v23  ;;  %v387_v25 = vpop.f32.mrb[1].mxu0 }
 0x150   :  { %v422_v26 = vadd.f32 %v418_v22, %v387_v25  ;;  %v389_v27 = vpop.f32.mrb[2].mxu0 }
 0x151   :  { %v423_v28 = vadd.f32 %v414_v21, %v389_v27  ;;  %v391_v29 = vpop.f32.mrb[3].mxu0  ;;  %v425_v31 = vmax.f32 %v421_v24, 0.0 }
 0x152   :  { %v424_v30 = vadd.f32 %v418_v22, %v391_v29  ;;  %v426_v33 = vmax.f32 %v422_v26, 0.0 }
 0x153   :  { %v427_v32 = vmax.f32 %v423_v28, 0.0 }
 0x154   :  { %v428_v34 = vmax.f32 %v424_v30, 0.0 }
 0x155   :  { %v429_v35 = vpack.c.bf16 %v427_v32, %v425_v31 }
 0x156   :  { %v430_v36 = vpack.c.bf16 %v428_v34, %v426_v33 }
 0x158   :  { %598 = vmatprep.mubr.bf16.mxu1 %v430_v36 }
 0x159   :  { %599 = vmatmul.mubr.bf16.vlgmr.msra.gmra.mrb[0].mxu1 %v429_v35 }
 0x22c   :  { %v745_v37 = vpop.f32.mrb[0].mxu1 }
 0x22d   :  { %v746_v38 = vpop.f32.mrb[1].mxu1 }
 0x22e   :  { %v747_v40 = vadd.f32 %v746_v38, %v745_v37  ;;  %v748_v41 = vpop.f32.mrb[2].mxu1 }
 0x22f   :  { %v749_v42 = vpop.f32.mrb[3].mxu1 }
 0x230   :  { %v750_v43 = vadd.f32 %v749_v42, %v748_v41  ;;  %v601_v44 = vadd.f32 %v747_v40, %v703_v39 }
 0x232   :  { %v611_v45 = vsel %vm609_vm0, %v601_v44, -inf  ;;  %v604_v46 = vadd.f32 %v750_v43, %v703_v39  ;;  %v631_v11 = vsel %vm610_vm1, %v601_v44, 0.0 }
 0x233   :  { %613 = vmax.xlane.f32.xlu0 %v611_v45 }
 0x234   :  { %v612_v47 = vsel %vm609_vm0, %v604_v46, -inf  ;;  %v632_v56 = vsel %vm610_vm1, %v604_v46, 0.0 }
 0x237   :  { %615 = vmax.xlane.f32.xlu0 %v612_v47 }
 0x23b   :  { %633 = vadd.xlane.f32.xlu0 %v631_v11 }
 0x2c0   :  { %v614_v48 = vpop.xlane.xlu0 %613 }
 0x2c1   :  { %v617_v49 = vsub.f32 %v611_v45, %v614_v48 }
 0x2c3   :  { %v619_v50 = vmul.f32 1.442695, %v617_v49 }
 0x2c4   :  { %v616_v51 = vpop.xlane.xlu0 %615 }
 0x2c5   :  { %826 = vpow2.f32 %v619_v50  ;;  %v618_v52 = vsub.f32 %v612_v47, %v616_v51 }
 0x2c7   :  { %v621_v53 = vmul.f32 1.442695, %v618_v52 }
 0x2c8   :  { %v634_v59 = vpop.xlane.xlu0 %633 }
 0x2c9   :  { %828 = vpow2.f32 %v621_v53 }
 0x2cf   :  { %v827_v54 = vpop.eup %826 }
 0x2d0   :  { %623 = vadd.xlane.f32.xlu1 %v827_v54 }
 0x2d3   :  { %v829_v55 = vpop.eup %828 }
 0x2d4   :  { %625 = vadd.xlane.f32.xlu1 %v829_v55 }
 0x2d8   :  { %635 = vadd.xlane.f32.xlu1 %v632_v56 }
 0x35d   :  { %v624_v57 = vpop.xlane.xlu1 %623 }
 0x35e   :  { %830 = vrcp.f32 %v624_v57 }
 0x361   :  { %v626_v58 = vpop.xlane.xlu1 %625 }
 0x362   :  { %832 = vrcp.f32 %v626_v58 }
 0x363   :  { %834 = vtanh.f32 %v634_v59 }
 0x365   :  { %v636_v60 = vpop.xlane.xlu1 %635 }
 0x366   :  { %836 = vtanh.f32 %v636_v60 }
 0x368   :  { %v831_v61 = vpop.eup %830 }
 0x369   :  { %v629_v62 = vmul.f32 %v831_v61, %v827_v54 }
 0x36b   :  { %v639_v1 = vsel %vm609_vm0, %v629_v62, 0.0 }
 0x36c   :  { %v833_v63 = vpop.eup %832 }
 0x36d   :  { %v630_v0 = vmul.f32 %v833_v63, %v829_v55  ;;  %v835_v2 = vpop.eup %834 }
 0x36e   :  { %v641_v5 = vsel %vm610_vm1, %v835_v2, %v639_v1 }
 0x36f   :  { %v640_v3 = vsel %vm609_vm0, %v630_v0, 0.0 }
 0x370   :  { %v837_v4 = vpop.eup %836 }
 0x371   :  { %v642_v6 = vsel %vm610_vm1, %v837_v4, %v640_v3 }
 0x372   :  { %v727_v7 = vpack.c.bf16 %v642_v6, %v641_v5 }
 0x374   :  { %728 = vst [vmem:[#allocation9] sm:$0xff] %v727_v7  }
 0x375   :  { %915 = shalt.err (!%p912_p0)
}
 0x376   :  { %s916_s15 = scalar_lea.hbm %s1071_s5, 128 }
 0x377   :  { %p917_p1 = scmp.ne.s32.totalorder %s1071_s5, %s916_s15  ;;  %p920_p2 = scmp.lt.u32.totalorder %s916_s15, %s1071_s5 }
 0x379   :  { %p922_p3 = pnand %p920_p2, %p917_p1 }
 0x37b   :  { %925 = shalt.err (!%p922_p3)
}
 0x37c   :  { %664 = dma.vmem_to_hbm [thread:$0]  %s659_s11, 128, %s1071_s5, [#allocation5], %s939_s0, %s939_s0, %s940_s6  }
 0x37d   :  { %930 = dma.done.wait [#allocation5], 128  }
 0x37e   :  { %931 = vsyncadd [#allocation5], 4294967168 }
 0x37f   :  { %668 = vsyncpa [#allocation4], 1 }
 0x380   :  { %669 = vsyncpa [#allocation7], 1 }
 0x381   :  { %670 = vsyncpa [#allocation5], 1 }

</bundles_post_ra>
